<compile_context>
chip_gen: v7x
topology: tpu7x:2x2x1
jax: 0.10.0
libtpu: 0.0.40
codegen_flags: <defaults>
</compile_context>

<pallas_src>
import functools

import jax
import jax.numpy as jnp
from jax.experimental import pallas as pl
from jax.experimental.pallas import tpu as pltpu

# ---------------------------------------------------------------------------
# Model dimensions (small, synthetic).
# ---------------------------------------------------------------------------
B = 2            # batch
C, H, W = 4, 16, 16
D = C * H * W    # 1024 flattened features
Z = 32           # bottleneck dim
K = 16           # number of classes
MC_SAMPLES = 3   # Monte-Carlo samples


# ---------------------------------------------------------------------------
# Pallas kernel: full VIB forward for ONE model (the grid axis selects
# teacher (block 0) or student (block 1)).
# ---------------------------------------------------------------------------
def student_teacher_kernel(x_ref, wenc_ref, benc_ref, wdec_ref, bdec_ref,
                           noise_ref, logits_ref, musd_ref):
    z_dim = wdec_ref.shape[0]
    mc = noise_ref.shape[0]

    x = x_ref[...]                                           # [B, D] bf16

    # Fused encoder: one MXU matmul yields [mu | pre_std] in a single pass
    # over the long D=1024 contraction (f32 accumulation).
    enc = jnp.dot(x, wenc_ref[...],
                  preferred_element_type=jnp.float32) + benc_ref[...]  # [B, 2Z]
    mu = enc[:, :z_dim]                                      # f32
    std = jax.nn.softplus(enc[:, z_dim:])                    # f32

    # Lane-dense packed stats output: [B, 2Z] = [mu | std], one store.
    musd_ref[...] = jnp.concatenate([mu, std], axis=-1)

    # All MC reparameterizations stacked along sublanes -> ONE decoder matmul
    # and ONE store (instead of MC tiny matmuls / masked stores).
    z_all = jnp.concatenate(
        [mu + std * noise_ref[m] for m in range(mc)], axis=0)  # [MC*B, Z] f32
    logits = jnp.dot(z_all.astype(jnp.bfloat16), wdec_ref[...],
                     preferred_element_type=jnp.float32) + bdec_ref[...]
    logits_ref[...] = logits                                  # [MC*B, K]


# ---------------------------------------------------------------------------
# Pallas wrapper: one call runs BOTH models (teacher idx 0, student idx 1).
# ---------------------------------------------------------------------------
@jax.jit
def student_teacher_pallas(x_flat_bf16, wenc, benc, wdec, bdec, noise):
    """Fused teacher+student VIB forward.

    x_flat_bf16: [B, D] bf16
    wenc:  [2, D, 2Z] bf16   ([w_mu | w_std] per model)
    benc:  [2, 1, 2Z] f32
    wdec:  [2, Z, K]  bf16
    bdec:  [2, 1, K]  f32
    noise: [MC, B, Z] f32 (shared between teacher and student)
    returns (logits [2, MC*B, K] f32, musd [2, B, 2Z] f32)
    """
    n_models = wenc.shape[0]
    bsz, d = x_flat_bf16.shape
    mc, _, z = noise.shape
    two_z = wenc.shape[-1]
    k = wdec.shape[-1]

    out_shapes = (
        jax.ShapeDtypeStruct((n_models, mc * bsz, k), jnp.float32),   # logits
        jax.ShapeDtypeStruct((n_models, bsz, two_z), jnp.float32),    # [mu|std]
    )

    flops = 2 * n_models * (bsz * d * two_z + mc * bsz * z * k)
    transcendentals = 2 * n_models * bsz * z                # softplus ~ exp+log1p
    bytes_accessed = (
        x_flat_bf16.size * 2 + wenc.size * 2 + wdec.size * 2
        + benc.size * 4 + bdec.size * 4 + noise.size * 4
        + (n_models * mc * bsz * k + n_models * bsz * two_z) * 4)

    grid_spec = pltpu.PrefetchScalarGridSpec(
        num_scalar_prefetch=0,
        grid=(n_models,),
        in_specs=[
            pl.BlockSpec((bsz, d), lambda i: (0, 0)),            # x (shared)
            pl.BlockSpec((None, d, two_z), lambda i: (i, 0, 0)),  # w_enc
            pl.BlockSpec((None, 1, two_z), lambda i: (i, 0, 0)),  # b_enc
            pl.BlockSpec((None, z, k), lambda i: (i, 0, 0)),      # w_dec
            pl.BlockSpec((None, 1, k), lambda i: (i, 0, 0)),      # b_dec
            pl.BlockSpec((mc, bsz, z), lambda i: (0, 0, 0)),      # noise (shared)
        ],
        out_specs=[
            pl.BlockSpec((None, mc * bsz, k), lambda i: (i, 0, 0)),
            pl.BlockSpec((None, bsz, two_z), lambda i: (i, 0, 0)),
        ],
    )

    return pl.pallas_call(
        student_teacher_kernel,
        out_shape=out_shapes,
        grid_spec=grid_spec,
        compiler_params=pltpu.CompilerParams(
            dimension_semantics=("parallel",)),   # 2 models -> 2 TCs on v7x
        cost_estimate=pl.CostEstimate(
            flops=flops,
            transcendentals=transcendentals,
            bytes_accessed=bytes_accessed),
    )(x_flat_bf16, wenc, benc, wdec, bdec, noise)


# ---------------------------------------------------------------------------
# Deterministic parameter initialization (synthetic, no checkpoint load).
# ---------------------------------------------------------------------------
def init_vib_params(key):
    k1, k2, k3, k4, k5, k6 = jax.random.split(key, 6)
    scale_enc = 1.0 / jnp.sqrt(jnp.float32(D))
    scale_dec = 1.0 / jnp.sqrt(jnp.float32(Z))
    return {
        'w_mu':  jax.random.normal(k1, (D, Z), jnp.float32) * scale_enc,
        'b_mu':  jax.random.normal(k2, (1, Z), jnp.float32) * 0.01,
        'w_std': jax.random.normal(k3, (D, Z), jnp.float32) * scale_enc,
        'b_std': jax.random.normal(k4, (1, Z), jnp.float32) * 0.01,
        'w_dec': jax.random.normal(k5, (Z, K), jnp.float32) * scale_dec,
        'b_dec': jax.random.normal(k6, (1, K), jnp.float32) * 0.01,
    }


def _fuse_params(p):
    """Concat mu/std encoder weights -> [D, 2Z] / [1, 2Z] (order: [mu | std])."""
    w_enc = jnp.concatenate([p['w_mu'], p['w_std']], axis=-1)
    b_enc = jnp.concatenate([p['b_mu'], p['b_std']], axis=-1)
    return w_enc, b_enc, p['w_dec'], p['b_dec']


# ---------------------------------------------------------------------------
# StudentTeacher.forward equivalent (teacher is not None).
# ---------------------------------------------------------------------------
def student_teacher_forward(x_nchw, teacher_params, student_params,
                            mc_samples, noise_key):
    bsz = x_nchw.shape[0]
    x_flat = x_nchw.reshape(bsz, -1).astype(jnp.float32)     # NCHW -> [B, C*H*W]

    # Teacher draws the reparameterization noise; student reuses it
    # (noise_list=params_teacher['noise'] in the reference module).
    noise = jax.random.normal(noise_key, (mc_samples, bsz, Z), jnp.float32)

    wenc_t, benc_t, wdec_t, bdec_t = _fuse_params(teacher_params)
    wenc_s, benc_s, wdec_s, bdec_s = _fuse_params(student_params)
    wenc = jnp.stack([wenc_t, wenc_s]).astype(jnp.bfloat16)   # [2, D, 2Z]
    benc = jnp.stack([benc_t, benc_s])                        # [2, 1, 2Z] f32
    wdec = jnp.stack([wdec_t, wdec_s]).astype(jnp.bfloat16)   # [2, Z, K]
    bdec = jnp.stack([bdec_t, bdec_s])                        # [2, 1, K] f32

    logits_slab, musd = student_teacher_pallas(
        x_flat.astype(jnp.bfloat16), wenc, benc, wdec, bdec, noise)

    # Unpack lane-dense slabs (pure layout plumbing, outside the kernel).
    logits = logits_slab.reshape(2, mc_samples, bsz, K)       # [model, MC, B, K]
    mu = musd[:, :, :Z]                                       # [model, B, Z]
    std = musd[:, :, Z:]                                      # [model, B, Z]

    ret_map = {
        'student': {
            'params': {'mu': mu[1], 'std': std[1], 'noise': noise},
            'logits': [logits[1, m] for m in range(mc_samples)],
        },
        'teacher': {
            'params': {'mu': mu[0], 'std': std[0], 'noise': noise},
            'logits': [logits[0, m] for m in range(mc_samples)],
        },
    }
    return ret_map


# ---------------------------------------------------------------------------
# Main.
# ---------------------------------------------------------------------------
if __name__ == "__main__":
    root = jax.random.PRNGKey(0)
    kx, kt, ks, kn = jax.random.split(root, 4)

    x = jax.random.normal(kx, (B, C, H, W), jnp.float32)      # NCHW like PyTorch
    teacher_params = init_vib_params(kt)
    student_params = init_vib_params(ks)

    ret_map = student_teacher_forward(x, teacher_params, student_params,
                                      MC_SAMPLES, kn)
    jax.block_until_ready(ret_map)

    # Plain-JAX reference of the same math (mirrors the kernel's bf16 matmul
    # operands with f32 accumulation).
    def ref_vib(x_flat, p, noise):
        rb = lambda a: a.astype(jnp.bfloat16).astype(jnp.float32)
        hp = jax.lax.Precision.HIGHEST
        xb = rb(x_flat)
        mu = jnp.dot(xb, rb(p['w_mu']), precision=hp) + p['b_mu']
        std = jax.nn.softplus(jnp.dot(xb, rb(p['w_std']), precision=hp)
                              + p['b_std'])
        wd = rb(p['w_dec'])
        logits = jnp.stack([jnp.dot(rb(mu + std * noise[m]), wd, precision=hp)
                            + p['b_dec'] for m in range(noise.shape[0])])
        return logits, mu, std

    x_flat = x.reshape(B, -1)
    noise = ret_map['student']['params']['noise']

    for name, params in (('student', student_params), ('teacher', teacher_params)):
        ref_logits, ref_mu, ref_std = ref_vib(x_flat, params, noise)
        got_logits = jnp.stack(ret_map[name]['logits'])
        assert got_logits.shape == (MC_SAMPLES, B, K)
        assert jnp.allclose(got_logits, ref_logits, atol=1e-3, rtol=1e-3), name
        assert jnp.allclose(ret_map[name]['params']['mu'], ref_mu,
                            atol=1e-3, rtol=1e-3), name
        assert jnp.allclose(ret_map[name]['params']['std'], ref_std,
                            atol=1e-3, rtol=1e-3), name

    # Teacher and student use different weights -> outputs must differ.
    assert not jnp.allclose(jnp.stack(ret_map['teacher']['logits']),
                            jnp.stack(ret_map['student']['logits']))

    print("KERNEL_OK")
</pallas_src>

<mosaic_0001>
module attributes {stable_mosaic.version = 11 : i64} {
  func.func @student_teacher_kernel(%arg0: i32, %arg1: memref<2x1024xbf16, #tpu.memory_space<vmem>>, %arg2: memref<1x1024x64xbf16, #tpu.memory_space<vmem>>, %arg3: memref<1x1x64xf32, #tpu.memory_space<vmem>>, %arg4: memref<1x32x16xbf16, #tpu.memory_space<vmem>>, %arg5: memref<1x1x16xf32, #tpu.memory_space<vmem>>, %arg6: memref<3x2x32xf32, #tpu.memory_space<vmem>>, %arg7: memref<1x6x16xf32, #tpu.memory_space<vmem>>, %arg8: memref<1x2x64xf32, #tpu.memory_space<vmem>>) attributes {dimension_semantics = [#tpu.dimension_semantics<parallel>], iteration_bounds = array<i64: 2>, scalar_prefetch = 0 : i64, scratch_operands = 0 : i64, tpu.core_type = #tpu.core_type<tc>, window_params = [{pipeline_mode = #tpu.pipeline_mode<synchronous>, transform_indices = @transform_0, window_bounds = array<i64: 2, 1024>}, {transform_indices = @transform_1, window_bounds = array<i64: 1, 1024, 64>}, {transform_indices = @transform_2, window_bounds = array<i64: 1, 1, 64>}, {transform_indices = @transform_3, window_bounds = array<i64: 1, 32, 16>}, {transform_indices = @transform_4, window_bounds = array<i64: 1, 1, 16>}, {pipeline_mode = #tpu.pipeline_mode<synchronous>, transform_indices = @transform_5, window_bounds = array<i64: 3, 2, 32>}, {transform_indices = @transform_6, window_bounds = array<i64: 1, 6, 16>}, {transform_indices = @transform_7, window_bounds = array<i64: 1, 2, 64>}]} {
    %c0 = arith.constant 0 : index
    %c0_0 = arith.constant 0 : index
    %0 = vector.load %arg1[%c0, %c0_0] : memref<2x1024xbf16, #tpu.memory_space<vmem>>, vector<2x1024xbf16>
    %c0_1 = arith.constant 0 : index
    %c0_2 = arith.constant 0 : index
    %c0_3 = arith.constant 0 : index
    %1 = vector.load %arg2[%c0_1, %c0_2, %c0_3] : memref<1x1024x64xbf16, #tpu.memory_space<vmem>>, vector<1x1024x64xbf16>
    %2 = vector.shape_cast %1 : vector<1x1024x64xbf16> to vector<1024x64xbf16>
    %cst = arith.constant dense<0.000000e+00> : vector<2x64xf32>
    %3 = tpu.matmul %0, %2, %cst {dimension_numbers = #tpu.dot_dimension_numbers<[1], [0], [0], [1], [0, 0, 1, 1], [], []>} : vector<2x1024xbf16>, vector<1024x64xbf16>, vector<2x64xf32> -> vector<2x64xf32>
    %c0_4 = arith.constant 0 : index
    %c0_5 = arith.constant 0 : index
    %c0_6 = arith.constant 0 : index
    %4 = vector.load %arg3[%c0_4, %c0_5, %c0_6] : memref<1x1x64xf32, #tpu.memory_space<vmem>>, vector<1x1x64xf32>
    %5 = vector.shape_cast %4 : vector<1x1x64xf32> to vector<1x64xf32>
    %6 = vector.broadcast %5 : vector<1x64xf32> to vector<2x64xf32>
    %7 = arith.addf %3, %6 : vector<2x64xf32>
    %8 = vector.extract_strided_slice %7 {offsets = [0, 0], sizes = [2, 32], strides = [1, 1]} : vector<2x64xf32> to vector<2x32xf32>
    %9 = vector.extract_strided_slice %7 {offsets = [0, 32], sizes = [2, 32], strides = [1, 1]} : vector<2x64xf32> to vector<2x32xf32>
    %cst_7 = arith.constant 0.000000e+00 : f32
    %10 = vector.broadcast %cst_7 : f32 to vector<2x32xf32>
    %11 = arith.maximumf %9, %10 : vector<2x32xf32>
    %12 = vector.broadcast %cst_7 : f32 to vector<2x32xf32>
    %13 = arith.subf %9, %12 : vector<2x32xf32>
    %14 = arith.cmpf one, %13, %13 : vector<2x32xf32>
    %15 = vector.broadcast %cst_7 : f32 to vector<2x32xf32>
    %16 = arith.addf %9, %15 : vector<2x32xf32>
    %17 = math.absf %13 : vector<2x32xf32>
    %cst_8 = arith.constant 0.000000e+00 : f32
    %18 = vector.broadcast %cst_8 : f32 to vector<2x32xf32>
    %19 = arith.subf %18, %17 : vector<2x32xf32>
    %20 = math.exp %19 : vector<2x32xf32>
    %21 = math.log1p %20 : vector<2x32xf32>
    %22 = arith.addf %11, %21 : vector<2x32xf32>
    %23 = arith.select %14, %16, %22 : vector<2x32xi1>, vector<2x32xf32>
    %24 = tpu.concatenate %8, %23 in 1 : vector<2x32xf32>, vector<2x32xf32> -> vector<2x64xf32>
    %c0_9 = arith.constant 0 : index
    %c0_10 = arith.constant 0 : index
    %c0_11 = arith.constant 0 : index
    %25 = vector.load %arg8[%c0_9, %c0_10, %c0_11] : memref<1x2x64xf32, #tpu.memory_space<vmem>>, vector<1x2x64xf32>
    %26 = vector.shape_cast %25 : vector<1x2x64xf32> to vector<2x64xf32>
    %27 = vector.shape_cast %24 : vector<2x64xf32> to vector<1x2x64xf32>
    tpu.vector_store %arg8[%c0_9, %c0_10, %c0_11], %27 {strides = array<i32>} : memref<1x2x64xf32, #tpu.memory_space<vmem>>, vector<1x2x64xf32>,
    %c0_12 = arith.constant 0 : index
    %c0_13 = arith.constant 0 : index
    %c0_14 = arith.constant 0 : index
    %28 = vector.load %arg6[%c0_12, %c0_13, %c0_14] : memref<3x2x32xf32, #tpu.memory_space<vmem>>, vector<1x2x32xf32>
    %29 = vector.shape_cast %28 : vector<1x2x32xf32> to vector<2x32xf32>
    %30 = arith.mulf %23, %29 : vector<2x32xf32>
    %31 = arith.addf %8, %30 : vector<2x32xf32>
    %c1 = arith.constant 1 : index
    %c0_15 = arith.constant 0 : index
    %c0_16 = arith.constant 0 : index
    %32 = vector.load %arg6[%c1, %c0_15, %c0_16] : memref<3x2x32xf32, #tpu.memory_space<vmem>>, vector<1x2x32xf32>
    %33 = vector.shape_cast %32 : vector<1x2x32xf32> to vector<2x32xf32>
    %34 = arith.mulf %23, %33 : vector<2x32xf32>
    %35 = arith.addf %8, %34 : vector<2x32xf32>
    %c2 = arith.constant 2 : index
    %c0_17 = arith.constant 0 : index
    %c0_18 = arith.constant 0 : index
    %36 = vector.load %arg6[%c2, %c0_17, %c0_18] : memref<3x2x32xf32, #tpu.memory_space<vmem>>, vector<1x2x32xf32>
    %37 = vector.shape_cast %36 : vector<1x2x32xf32> to vector<2x32xf32>
    %38 = arith.mulf %23, %37 : vector<2x32xf32>
    %39 = arith.addf %8, %38 : vector<2x32xf32>
    %40 = tpu.concatenate %31, %35, %39 in 0 : vector<2x32xf32>, vector<2x32xf32>, vector<2x32xf32> -> vector<6x32xf32>
    %41 = arith.truncf %40 : vector<6x32xf32> to vector<6x32xbf16>
    %c0_19 = arith.constant 0 : index
    %c0_20 = arith.constant 0 : index
    %c0_21 = arith.constant 0 : index
    %42 = vector.load %arg4[%c0_19, %c0_20, %c0_21] : memref<1x32x16xbf16, #tpu.memory_space<vmem>>, vector<1x32x16xbf16>
    %43 = vector.shape_cast %42 : vector<1x32x16xbf16> to vector<32x16xbf16>
    %cst_22 = arith.constant dense<0.000000e+00> : vector<6x16xf32>
    %44 = tpu.matmul %41, %43, %cst_22 {dimension_numbers = #tpu.dot_dimension_numbers<[1], [0], [0], [1], [0, 0, 1, 1], [], []>} : vector<6x32xbf16>, vector<32x16xbf16>, vector<6x16xf32> -> vector<6x16xf32>
    %c0_23 = arith.constant 0 : index
    %c0_24 = arith.constant 0 : index
    %c0_25 = arith.constant 0 : index
    %45 = vector.load %arg5[%c0_23, %c0_24, %c0_25] : memref<1x1x16xf32, #tpu.memory_space<vmem>>, vector<1x1x16xf32>
    %46 = vector.shape_cast %45 : vector<1x1x16xf32> to vector<1x16xf32>
    %47 = vector.broadcast %46 : vector<1x16xf32> to vector<6x16xf32>
    %48 = arith.addf %44, %47 : vector<6x16xf32>
    %c0_26 = arith.constant 0 : index
    %c0_27 = arith.constant 0 : index
    %c0_28 = arith.constant 0 : index
    %49 = vector.load %arg7[%c0_26, %c0_27, %c0_28] : memref<1x6x16xf32, #tpu.memory_space<vmem>>, vector<1x6x16xf32>
    %50 = vector.shape_cast %49 : vector<1x6x16xf32> to vector<6x16xf32>
    %51 = vector.shape_cast %48 : vector<6x16xf32> to vector<1x6x16xf32>
    tpu.vector_store %arg7[%c0_26, %c0_27, %c0_28], %51 {strides = array<i32>} : memref<1x6x16xf32, #tpu.memory_space<vmem>>, vector<1x6x16xf32>,
    return
  }
  func.func @transform_0(%arg0: i32) -> (i32, i32) {
    %c0_i32 = arith.constant 0 : i32
    %c0_i32_0 = arith.constant 0 : i32
    %c0_i32_1 = arith.constant 0 : i32
    return %c0_i32, %c0_i32_0 : i32, i32
  }
  func.func @transform_1(%arg0: i32) -> (i32, i32, i32) {
    %c0_i32 = arith.constant 0 : i32
    %c0_i32_0 = arith.constant 0 : i32
    %c0_i32_1 = arith.constant 0 : i32
    return %arg0, %c0_i32, %c0_i32_0 : i32, i32, i32
  }
  func.func @transform_2(%arg0: i32) -> (i32, i32, i32) {
    %c0_i32 = arith.constant 0 : i32
    %c0_i32_0 = arith.constant 0 : i32
    %c0_i32_1 = arith.constant 0 : i32
    return %arg0, %c0_i32, %c0_i32_0 : i32, i32, i32
  }
  func.func @transform_3(%arg0: i32) -> (i32, i32, i32) {
    %c0_i32 = arith.constant 0 : i32
    %c0_i32_0 = arith.constant 0 : i32
    %c0_i32_1 = arith.constant 0 : i32
    return %arg0, %c0_i32, %c0_i32_0 : i32, i32, i32
  }
  func.func @transform_4(%arg0: i32) -> (i32, i32, i32) {
    %c0_i32 = arith.constant 0 : i32
    %c0_i32_0 = arith.constant 0 : i32
    %c0_i32_1 = arith.constant 0 : i32
    return %arg0, %c0_i32, %c0_i32_0 : i32, i32, i32
  }
  func.func @transform_5(%arg0: i32) -> (i32, i32, i32) {
    %c0_i32 = arith.constant 0 : i32
    %c0_i32_0 = arith.constant 0 : i32
    %c0_i32_1 = arith.constant 0 : i32
    %c0_i32_2 = arith.constant 0 : i32
    return %c0_i32, %c0_i32_0, %c0_i32_1 : i32, i32, i32
  }
  func.func @transform_6(%arg0: i32) -> (i32, i32, i32) {
    %c0_i32 = arith.constant 0 : i32
    %c0_i32_0 = arith.constant 0 : i32
    %c0_i32_1 = arith.constant 0 : i32
    return %arg0, %c0_i32, %c0_i32_0 : i32, i32, i32
  }
  func.func @transform_7(%arg0: i32) -> (i32, i32, i32) {
    %c0_i32 = arith.constant 0 : i32
    %c0_i32_0 = arith.constant 0 : i32
    %c0_i32_1 = arith.constant 0 : i32
    return %arg0, %c0_i32, %c0_i32_0 : i32, i32, i32
  }
}

</mosaic_0001>

<bundles_post_ra>
// kernel: student_teacher_pallas.1
= control target key start
LH: loop header
LB: loop body
LE: loop exit
PB: predicated region body
PF: predicated region fallthrough
CT: control target
= control target key end

     0   :  { %13 = vsyncpa [#allocation3], 0  ;;  %s1974_s0 = inlined_call_operand.vmem [shape: bf16[2,1024], index: 0, kind: input, shape index: {}]   ;;  %s1975_s1 = inlined_call_operand.vmem [shape: bf16[2,1024,64], index: 1, kind: input, shape index: {}]   ;;  %s1976_s2 = inlined_call_operand.vmem [shape: f32[2,1,64], index: 2, kind: input, shape index: {}]   ;;  %s1977_s3 = inlined_call_operand.vmem [shape: bf16[2,32,16], index: 3, kind: input, shape index: {}]   ;;  %s1978_s4 = inlined_call_operand.vmem [shape: f32[2,1,16], index: 4, kind: input, shape index: {}]   ;;  %s1979_s5 = inlined_call_operand.vmem [shape: f32[3,2,32], index: 5, kind: input, shape index: {}]   ;;  %s1980_s6 = inlined_call_operand.vmem [shape: f32[2,6,16], index: 6, kind: output, shape index: {0}]   ;;  %s1981_s7 = inlined_call_operand.hbm [shape: f32[2,2,64], index: 7, kind: output, shape index: {1}]  }
   0x1   :  { %15 = vsyncpa [#allocation3 + $0x1], 0  ;;  %s1756_s24 = smov 0   ;;  %s1758_s25 = smov 0  }
   0x2   :  { %s1760_s26 = smov 0   ;;  %s1762_s27 = smov 0  }
   0x3 LB: > { %s1777_s28 = sadd.s32 4294967295, %s1708_s27   ;;  %s1345_s29 = sadd.s32 4294967294, %s1708_s27   ;;  %s1708_s27 = sphi %s1762_s27, %s1987_s27   ;;  %s1704_s26 = sphi %s1760_s26, %s1986_s26   ;;  %s1700_s25 = sphi %s1758_s25, %s1985_s25   ;;  %s1696_s24 = sphi %s1756_s24, %s1984_s24  }
   0x4   : > { %s1781_s30 = sadd.s32 1, %s1708_s27   ;;  %s200_s8 = sadd.s32 1, %s1704_s26 }
   0x5   : > { %s197_s9 = ssub.s32 %s1708_s27, %s1781_s30  ;;  %p210_p0 = scmp.ne.s32.totalorder %s1704_s26, %s1700_s25 }
   0x6   : > { %p198_p1 = scmp.eq.s32.totalorder %s197_s9, 0  ;;  %p211_p2 = scmp.eq.s32.totalorder %s1777_s28, 1 }
   0x7   : > { %p216_p3 = scmp.ne.s32.totalorder %s1700_s25, %s1696_s24  ;;  %p217_p4 = scmp.eq.s32.totalorder %s1345_s29, 1 }
   0x8   : > { %s1792_s10 = scalar_select %p198_p1, %s1704_s26, %s200_s8  }
   0x9   : > { %p1794_p5 = por %p211_p2, %p210_p0  ;;  %p1798_p6 = por %p217_p4, %p216_p3 }
   0xa   : > { %p1348_p7 = scmp.ge.s32.totalorder %s1708_s27, 1  ;;  %p269_p8 = scmp.lt.s32.totalorder %s1708_s27, 3 }
   0xc   : > { %p270_p9 = pnand %p1348_p7, %p269_p8 }
   0xd   : > { %p316_p10 = scmp.lt.s32.totalorder (!%p270_p9), %s1777_s28, 1  ;;  %v478_v0 = vlaneseq (!%p270_p9)  ;;  %v1710_v1 = vmov (!%p270_p9), 1966171168   ;;  %v1420_v3 = vld [vmem:[%s1979_s5 + $0x2] sm:$0x3] (!%p270_p9)  ;;  %s1711_s18 = smov (!%p270_p9), 32  }
   0xe   : > { %273 = sbr.rel (%p270_p9) target bundleno = 688 (0x2b0), region = 44  ;;  %v476_v2 = vunpack.c.l.s4 (!%p270_p9), %v1710_v1  ;;  %v1097_v4 = vld [vmem:[%s1979_s5] sm:$0x3] (!%p270_p9)  ;;  %1111 = vrot.lane.b32.xlu0 (!%p270_p9), %v1420_v3, %s1711_s18  ;;  %v1421_v7 = vld [vmem:[%s1979_s5 + $0x4] sm:$0x3] (!%p270_p9)  ;;  %vm1093_vm1 = vcmask (!%p270_p9), 261120  }
   0xf   : > { %v479_v5 = vshrl.u32 (!%p270_p9), %v478_v0, 7  ;;  %1099 = vrot.lane.b32.xlu1 (!%p270_p9), %v1097_v4, %s1711_s18  ;;  %v337_v8 = vld [vmem:[%s1974_s0] sm:$0xff] (!%p270_p9)  ;;  %vm1713_vm3 = vmmov (!%p270_p9), 0   ;;  %vm1095_vm4 = vcmask (!%p270_p9), 517120   ;;  %s1714_s29 = smov (!%p270_p9), 96   ;;  %vm1138_vm5 = vcmask (!%p270_p9), 1041408  }
  0x10   : > { %v477_v6 = vunpack.c.0.s8 (!%p270_p9), %v476_v2  ;;  %v474_v33 = vcombine.high (!%p270_p9), %v337_v8, %v337_v8  ;;  %vm1140_vm6 = vcmask (!%p270_p9), 1043456   ;;  %s1427_s8 = sshll.u32 (!%p270_p9), %s1777_s28, 5  ;;  %s1715_s19 = smov (!%p270_p9), [#allocation2]  }
  0x12   : > { %v1826_v9 = vsub.s32 (!%p270_p9), %v477_v6, %v479_v5  ;;  %1123 = vrot.lane.b32.xlu0 (!%p270_p9), %v1421_v7, %s1711_s18 }
  0x14   : > { %v1831_v12 = vrot.slane (!%p270_p9), %v337_v8, %v1826_v9  ;;  %v1858_v38 = vrot.slane (!%p270_p9), %v474_v33, %v1826_v9 }
  0x15   : > { %s1812_s17 = scalar_select %p316_p10, %s1777_s28, 1 }
  0x16   : > { %v489_v15 = vcombine.high %v1831_v12, %v1831_v12  ;;  %v490_v43 = vcombine.high %v1858_v38, %v1858_v38  ;;  %v497_v46 = vrot.slane %v1831_v12, %v1826_v9 }
  0x17   : > { %s1430_s21 = sshll.u32 %s1812_s17, 9  ;;  %s323_s15 = scalar_lea.vmem %s1976_s2, %s1812_s17 }
  0x18   : > { %s1824_s9 = scalar_lea.vmem %s1975_s1, %s1430_s21  ;;  %v511_v18 = vrot.slane %v489_v15, %v1826_v9  ;;  %v518_v49 = vrot.slane %v490_v43, %v1826_v9  ;;  %v519_v51 = vcombine.high %v497_v46, %v497_v46  ;;  %s1431_s16 = sshll.u32 %s1812_s17, 4 }
  0x19   : > { %v1575_v10 = vld [vmem:[%s1824_s9 + $0x40] sm:$0xff]   ;;  %v1579_v16 = vld [vmem:[%s1824_s9 + $0x48] sm:$0xff]   ;;  %v1583_v22 = vld [vmem:[%s1824_s9 + $0x50] sm:$0xff]   ;;  %s328_s20 = scalar_lea.vmem %s1977_s3, %s1431_s16  ;;  %s313_s21 = sand.u32 1, %s1700_s25  }
  0x1a   : > { %v1576_v11 = vld [vmem:[%s1824_s9 + $0xc0] sm:$0xff]   ;;  %1432 = vmatprep.subr.bf16.mxu0 %v1575_v10  ;;  %v1580_v17 = vld [vmem:[%s1824_s9 + $0xc8] sm:$0xff]   ;;  %947 = vmatprep.mubr.bf16.mxu0 %v511_v18  ;;  %v521_v21 = vcombine.high %v511_v18, %v511_v18  ;;  %v1584_v23 = vld [vmem:[%s1824_s9 + $0xd0] sm:$0xff]   ;;  %v522_v55 = vcombine.high %v518_v49, %v518_v49  ;;  %s1919_s22 = sshll.u32 %s313_s21, 1  ;;  %s1216_s16 = scalar_lea.sflag [#allocation3], %s313_s21 }
  0x1b   : > { %v1577_v13 = vld [vmem:[%s1824_s9] sm:$0xff]   ;;  %1454 = vmatprep.subr.bf16.mxu1 %v1576_v11  ;;  %v1581_v19 = vld [vmem:[%s1824_s9 + $0x8] sm:$0xff]   ;;  %v1585_v24 = vld [vmem:[%s1824_s9 + $0x10] sm:$0xff]   ;;  %s315_s23 = scalar_lea.vmem [#allocation2], %s1919_s22 }
  0x1c   : > { %v1578_v14 = vld [vmem:[%s1824_s9 + $0x80] sm:$0xff]   ;;  %1433 = vmatpush3.bf16.msra.mxu0 %v1577_v13  ;;  %v1582_v20 = vld [vmem:[%s1824_s9 + $0x88] sm:$0xff]   ;;  %987 = vmatprep.mubr.bf16.mxu1 %v521_v21  ;;  %v1586_v25 = vld [vmem:[%s1824_s9 + $0x90] sm:$0xff]  }
  0x1d   : > { %1455 = vmatpush3.bf16.msra.mxu1 %v1578_v14  ;;  %1434 = vmatprep.subr.bf16.mxu0 %v1579_v16  ;;  %v1587_v26 = vld [vmem:[%s1824_s9 + $0x58] sm:$0xff]   ;;  %v1591_v30 = vld [vmem:[%s1824_s9 + $0x60] sm:$0xff]   ;;  %v1595_v35 = vld [vmem:[%s1824_s9 + $0x68] sm:$0xff]  }
  0x1e   : > { %1456 = vmatprep.subr.bf16.mxu1 %v1580_v17  ;;  %v1588_v27 = vld [vmem:[%s1824_s9 + $0xd8] sm:$0xff]   ;;  %v1592_v31 = vld [vmem:[%s1824_s9 + $0xe0] sm:$0xff]   ;;  %v1596_v36 = vld [vmem:[%s1824_s9 + $0xe8] sm:$0xff]  }
  0x1f   : > { %v1589_v28 = vld [vmem:[%s1824_s9 + $0x18] sm:$0xff]   ;;  %v1593_v32 = vld [vmem:[%s1824_s9 + $0x20] sm:$0xff]   ;;  %v1597_v37 = vld [vmem:[%s1824_s9 + $0x28] sm:$0xff]  }
  0x20   : > { %1435 = vmatpush3.bf16.msra.mxu0 %v1581_v19  ;;  %v1590_v29 = vld [vmem:[%s1824_s9 + $0x98] sm:$0xff]   ;;  %v1594_v34 = vld [vmem:[%s1824_s9 + $0xa0] sm:$0xff]   ;;  %v1598_v39 = vld [vmem:[%s1824_s9 + $0xa8] sm:$0xff]   ;;  %v504_v19 = vrot.slane %v1858_v38, %v1826_v9 }
  0x21   : > { %1457 = vmatpush3.bf16.msra.mxu1 %v1582_v20  ;;  %1436 = vmatprep.subr.bf16.mxu0 %v1583_v22  ;;  %v1599_v40 = vld [vmem:[%s1824_s9 + $0x70] sm:$0xff]   ;;  %v1603_v45 = vld [vmem:[%s1824_s9 + $0x78] sm:$0xff]   ;;  %v1608_v52 = vld [vmem:[%s1824_s9 + $0x140] sm:$0xff]  }
  0x22   : > { %1458 = vmatprep.subr.bf16.mxu1 %v1584_v23  ;;  %v1600_v41 = vld [vmem:[%s1824_s9 + $0xf0] sm:$0xff]   ;;  %v1604_v47 = vld [vmem:[%s1824_s9 + $0xf8] sm:$0xff]   ;;  %v1609_v53 = vld [vmem:[%s1824_s9 + $0x1c0] sm:$0xff]   ;;  %v520_v23 = vcombine.high %v504_v19, %v504_v19 }
  0x23   : > { %v1601_v42 = vld [vmem:[%s1824_s9 + $0x30] sm:$0xff]   ;;  %v1605_v48 = vld [vmem:[%s1824_s9 + $0x38] sm:$0xff]   ;;  %v1610_v54 = vld [vmem:[%s1824_s9 + $0x100] sm:$0xff]  }
  0x24   : > { %1437 = vmatpush3.bf16.msra.mxu0 %v1585_v24  ;;  %v1602_v44 = vld [vmem:[%s1824_s9 + $0xb0] sm:$0xff]   ;;  %v1606_v50 = vld [vmem:[%s1824_s9 + $0xb8] sm:$0xff]   ;;  %v1611_v56 = vld [vmem:[%s1824_s9 + $0x180] sm:$0xff]  }
  0x25   : > { %1459 = vmatpush3.bf16.msra.mxu1 %v1586_v25  ;;  %1438 = vmatprep.subr.bf16.mxu0 %v1587_v26  ;;  %v1612_v57 = vld [vmem:[%s1824_s9 + $0x148] sm:$0xff]   ;;  %v1616_v61 = vld [vmem:[%s1824_s9 + $0x150] sm:$0xff]   ;;  %v1620_v1 = vld [vmem:[%s1824_s9 + $0x158] sm:$0xff]  }
  0x26   : > { %1460 = vmatprep.subr.bf16.mxu1 %v1588_v27  ;;  %v1613_v58 = vld [vmem:[%s1824_s9 + $0x1c8] sm:$0xff]   ;;  %v1617_v62 = vld [vmem:[%s1824_s9 + $0x1d0] sm:$0xff]   ;;  %v1621_v2 = vld [vmem:[%s1824_s9 + $0x1d8] sm:$0xff]  }
  0x27   : > { %v1614_v59 = vld [vmem:[%s1824_s9 + $0x108] sm:$0xff]   ;;  %v1618_v63 = vld [vmem:[%s1824_s9 + $0x110] sm:$0xff]   ;;  %v1622_v3 = vld [vmem:[%s1824_s9 + $0x118] sm:$0xff]  }
  0x28   : > { %1439 = vmatpush3.bf16.msra.mxu0 %v1589_v28  ;;  %v1615_v60 = vld [vmem:[%s1824_s9 + $0x188] sm:$0xff]   ;;  %v1619_v0 = vld [vmem:[%s1824_s9 + $0x190] sm:$0xff]   ;;  %v1623_v4 = vld [vmem:[%s1824_s9 + $0x198] sm:$0xff]  }
  0x29   : > { %1461 = vmatpush3.bf16.msra.mxu1 %v1590_v29  ;;  %1440 = vmatprep.subr.bf16.mxu0 %v1591_v30  ;;  %v1624_v5 = vld [vmem:[%s1824_s9 + $0x160] sm:$0xff]   ;;  %v1628_v10 = vld [vmem:[%s1824_s9 + $0x168] sm:$0xff]   ;;  %v1632_v14 = vld [vmem:[%s1824_s9 + $0x170] sm:$0xff]  }
  0x2a   : > { %1462 = vmatprep.subr.bf16.mxu1 %v1592_v31  ;;  %v1625_v6 = vld [vmem:[%s1824_s9 + $0x1e0] sm:$0xff]   ;;  %v1629_v11 = vld [vmem:[%s1824_s9 + $0x1e8] sm:$0xff]   ;;  %v1633_v15 = vld [vmem:[%s1824_s9 + $0x1f0] sm:$0xff]  }
  0x2b   : > { %v1626_v7 = vld [vmem:[%s1824_s9 + $0x120] sm:$0xff]   ;;  %v1630_v12 = vld [vmem:[%s1824_s9 + $0x128] sm:$0xff]   ;;  %v1634_v16 = vld [vmem:[%s1824_s9 + $0x130] sm:$0xff]  }
  0x2c   : > { %1441 = vmatpush3.bf16.msra.mxu0 %v1593_v32  ;;  %v1627_v8 = vld [vmem:[%s1824_s9 + $0x1a0] sm:$0xff]   ;;  %v1631_v13 = vld [vmem:[%s1824_s9 + $0x1a8] sm:$0xff]   ;;  %v1635_v17 = vld [vmem:[%s1824_s9 + $0x1b0] sm:$0xff]  }
  0x2d   : > { %1463 = vmatpush3.bf16.msra.mxu1 %v1594_v34  ;;  %1442 = vmatprep.subr.bf16.mxu0 %v1595_v35  ;;  %v1636_v18 = vld [vmem:[%s1824_s9 + $0x178] sm:$0xff]   ;;  %v1355_v26 = vld [vmem:[%s323_s15] ss:$0 sm:$0xff]  ;;  %s1928_s15 = scalar_lea.hbm %s1981_s7, %s1427_s8 }
  0x2e   : > { %1464 = vmatprep.subr.bf16.mxu1 %v1596_v36  ;;  %v1637_v20 = vld [vmem:[%s1824_s9 + $0x1f8] sm:$0xff]  }
  0x2f   : > { %v1638_v21 = vld [vmem:[%s1824_s9 + $0x138] sm:$0xff]  }
  0x30   : > { %1443 = vmatpush3.bf16.msra.mxu0 %v1597_v37  ;;  %v1639_v22 = vld [vmem:[%s1824_s9 + $0x1b8] sm:$0xff]   ;;  %s1232_s9 = sshll.u32 %s315_s23, 4  ;;  %s1233_s9 = int_to_ptr.vmem [resolvable:$true] %s1232_s9 }
  0x31   : > { %1465 = vmatpush3.bf16.msra.mxu1 %v1598_v39  ;;  %1444 = vmatprep.subr.bf16.mxu0 %v1599_v40  ;;  %s1646_s18 = scalar_lea.vmem %s1233_s9, 32 }
  0x32   : > { %1466 = vmatprep.subr.bf16.mxu1 %v1600_v41  ;;  %p1647_p11 = scmp.ne.s32.totalorder %s1233_s9, %s1646_s18 }
  0x34   : > { %1445 = vmatpush3.bf16.msra.mxu0 %v1601_v42  ;;  %p1648_p12 = pnand %p1647_p11, %p1794_p5 }
  0x35   : > { %1467 = vmatpush3.bf16.msra.mxu1 %v1602_v44  ;;  %1446 = vmatprep.subr.bf16.mxu0 %v1603_v45 }
  0x36   : > { %1468 = vmatprep.subr.bf16.mxu1 %v1604_v47  ;;  %p1649_p13 = pneg %p1648_p12 }
  0x38   : > { %1447 = vmatpush3.bf16.msra.mxu0 %v1605_v48 }
  0x39   : > { %1469 = vmatpush3.bf16.msra.mxu1 %v1606_v50  ;;  %1476 = vmatprep.subr.bf16.mxu0 %v1608_v52 }
  0x3a   : > { %1498 = vmatprep.subr.bf16.mxu1 %v1609_v53 }
  0x3b   : > { %948 = vmatmul.mubr.bf16.vlgmr.msra.gmra.mrb[0].mxu0 %v497_v46 }
  0x3c   : > { %988 = vmatmul.mubr.bf16.vlgmr.msra.gmra.mrb[0].mxu1 %v519_v51  ;;  %1477 = vmatpush3.bf16.msra.mxu0 %v1610_v54 }
  0x3d   : > { %1499 = vmatpush3.bf16.msra.mxu1 %v1611_v56  ;;  %1027 = vmatprep.mubr.bf16.mxu0 %v518_v49 }
  0x3e   : > { %1478 = vmatprep.subr.bf16.mxu0 %v1612_v57  ;;  %1067 = vmatprep.mubr.bf16.mxu1 %v522_v55  ;;  %v1640_v57 = vld [vmem:[%s328_s20] sm:$0xff]  }
  0x3f   : > { %1500 = vmatprep.subr.bf16.mxu1 %v1613_v58  ;;  %v1712_v58 = vmov 0.0  }
  0x40   : > { %1479 = vmatpush3.bf16.msra.mxu0 %v1614_v59 }
  0x41   : > { %1501 = vmatpush3.bf16.msra.mxu1 %v1615_v60  ;;  %1480 = vmatprep.subr.bf16.mxu0 %v1616_v61 }
  0x42   : > { %1502 = vmatprep.subr.bf16.mxu1 %v1617_v62 }
  0x44   : > { %1481 = vmatpush3.bf16.msra.mxu0 %v1618_v63  ;;  %v1641_v63 = vld [vmem:[%s328_s20 + $0x8] sm:$0xff]   ;;  %s1650_s20 = sshll.u32 %s1715_s19, 4  ;;  %s1651_s20 = int_to_ptr.vmem [resolvable:$false] %s1650_s20 }
  0x45   : > { %1503 = vmatpush3.bf16.msra.mxu1 %v1619_v0  ;;  %1482 = vmatprep.subr.bf16.mxu0 %v1620_v1  ;;  %s1652_s22 = scalar_lea.vmem %s1651_s20, 64  ;;  %p1653_p0 = scmp.lt.s32.totalorder %s1233_s9, %s1651_s20 }
  0x46   : > { %1504 = vmatprep.subr.bf16.mxu1 %v1621_v2  ;;  %p1654_p1 = scmp.lt.s32.totalorder %s1652_s22, %s1646_s18 }
  0x48   : > { %1483 = vmatpush3.bf16.msra.mxu0 %v1622_v3  ;;  %p1655_p2 = por %p1654_p1, %p1653_p0 }
  0x49   : > { %1505 = vmatpush3.bf16.msra.mxu1 %v1623_v4  ;;  %1484 = vmatprep.subr.bf16.mxu0 %v1624_v5 }
  0x4a   : > { %1506 = vmatprep.subr.bf16.mxu1 %v1625_v6  ;;  %p1656_p3 = pnand %p1655_p2, %p1649_p13 }
  0x4c   : > { %1485 = vmatpush3.bf16.msra.mxu0 %v1626_v7 }
  0x4d   : > { %1507 = vmatpush3.bf16.msra.mxu1 %v1627_v8  ;;  %1486 = vmatprep.subr.bf16.mxu0 %v1628_v10 }
  0x4e   : > { %1508 = vmatprep.subr.bf16.mxu1 %v1629_v11 }
  0x50   : > { %1487 = vmatpush3.bf16.msra.mxu0 %v1630_v12 }
  0x51   : > { %1509 = vmatpush3.bf16.msra.mxu1 %v1631_v13  ;;  %1488 = vmatprep.subr.bf16.mxu0 %v1632_v14 }
  0x52   : > { %1510 = vmatprep.subr.bf16.mxu1 %v1633_v15 }
  0x54   : > { %1489 = vmatpush3.bf16.msra.mxu0 %v1634_v16 }
  0x55   : > { %1511 = vmatpush3.bf16.msra.mxu1 %v1635_v17  ;;  %1490 = vmatprep.subr.bf16.mxu0 %v1636_v18 }
  0x56   : > { %1512 = vmatprep.subr.bf16.mxu1 %v1637_v20 }
  0x58   : > { %1491 = vmatpush3.bf16.msra.mxu0 %v1638_v21 }
  0x59   : > { %1513 = vmatpush3.bf16.msra.mxu1 %v1639_v22  ;;  %1523 = vmatprep.subr.bf16.mxu0 %v1712_v58 }
  0x5b   : > { %1028 = vmatmul.mubr.bf16.vlgmr.msra.gmra.mrb[4].mxu0 %v504_v19 }
  0x5c   : > { %1068 = vmatmul.mubr.bf16.vlgmr.msra.gmra.mrb[4].mxu1 %v520_v23  ;;  %1524 = vmatpush3.bf16.msra.mxu0 %v1640_v57 }
  0x5d   : > { %1525 = vmatprep.subr.bf16.mxu0 %v1712_v58  ;;  %1527 = vmatprep.mubr.msk.bf16.mxu0 %vm1713_vm3, %v1712_v58 }
  0x60   : > { %1526 = vmatpush3.bf16.msra.mxu0 %v1641_v63 }
  0x80   : > { %v1112_v56 = vpop.permute.xlu0 %1111 }
  0x81   : > { %v1100_v7 = vpop.permute.xlu1 %1099 }
  0x84   : > { %v1124_v2 = vpop.permute.xlu0 %1123 }
 0x10e   : > { %v1448_v24 = vpop.f32.mrb[0].mxu0 }
 0x10f   : > { %v1470_v25 = vpop.f32.mrb[0].mxu1  ;;  %v1449_v27 = vpop.f32.mrb[1].mxu0 }
 0x110   : > { %v1450_v9 = vadd.f32 %v1449_v27, %v1448_v24  ;;  %v1471_v28 = vpop.f32.mrb[1].mxu1  ;;  %v1451_v29 = vpop.f32.mrb[2].mxu0 }
 0x111   : > { %v1472_v30 = vadd.f32 %v1471_v28, %v1470_v25  ;;  %v1473_v31 = vpop.f32.mrb[2].mxu1  ;;  %v1452_v32 = vpop.f32.mrb[3].mxu0 }
 0x112   : > { %v950_v33 = vadd.f32 %v1450_v9, %v1355_v26  ;;  %v1474_v34 = vpop.f32.mrb[3].mxu1 }
 0x114   : > { %v990_v35 = vadd.f32 %v1472_v30, %v950_v33 }
 0x12e   : > { %v1492_v36 = vpop.f32.mrb[4].mxu0 }
 0x12f   : > { %v1514_v37 = vpop.f32.mrb[4].mxu1  ;;  %v1493_v38 = vpop.f32.mrb[5].mxu0 }
 0x130   : > { %v1494_v39 = vadd.f32 %v1493_v38, %v1492_v36  ;;  %v1515_v40 = vpop.f32.mrb[5].mxu1  ;;  %v1495_v41 = vpop.f32.mrb[6].mxu0 }
 0x131   : > { %v1516_v42 = vadd.f32 %v1515_v40, %v1514_v37  ;;  %v1517_v43 = vpop.f32.mrb[6].mxu1  ;;  %v1496_v44 = vpop.f32.mrb[7].mxu0 }
 0x132   : > { %v1030_v45 = vadd.f32 %v1494_v39, %v990_v35  ;;  %v1518_v46 = vpop.f32.mrb[7].mxu1 }
 0x134   : > { %v1070_v47 = vadd.f32 %v1516_v42, %v1030_v45 }
 0x136   : > { %v1078_v48 = vand.u32 2147483647, %v1070_v47  ;;  %v1075_v62 = vmax.f32 %v1070_v47, 0.0  ;;  %vm1076_vm2 = vcmp.ne.f32.partialorder %v1070_v47, %v1070_v47 }
 0x138   : > { %v1079_v49 = vsub.f32 0.0, %v1078_v48 }
 0x13a   : > { %v1080_v50 = vmul.f32 1.442695, %v1079_v49 }
 0x13c   : > { %1642 = vpow2.f32 %v1080_v50 }
 0x146   : > { %v1643_v51 = vpop.eup %1642 }
 0x147   : > { %v1082_v52 = vadd.f32 1.0, %v1643_v51  ;;  %v1085_v53 = vmul.f32 -0.5, %v1643_v51  ;;  %v1088_v55 = vand.u32 2147483647, %v1643_v51 }
 0x149   : > { %1644 = vlog2.f32 %v1082_v52  ;;  %v1086_v54 = vadd.f32 1.0, %v1085_v53  ;;  %vm1089_vm0 = vcmp.lt.f32.partialorder %v1088_v55, 0.0004427343 }
 0x14b   : > { %v1087_v61 = vmul.f32 %v1643_v51, %v1086_v54 }
 0x153   : > { %v1645_v59 = vpop.eup %1644 }
 0x154   : > { %v1084_v60 = vmul.f32 0.6931472, %v1645_v59 }
 0x156   : > { %v1090_v0 = vsel %vm1089_vm0, %v1087_v61, %v1084_v60 }
 0x157   : > { %v1091_v1 = vadd.f32 %v1090_v0, %v1075_v62 }
 0x159   : > { %v1092_v3 = vsel %vm1076_vm2, %v1070_v47, %v1091_v1 }
 0x15a   : > { %v1114_v4 = vmul.f32 %v1112_v56, %v1092_v3  ;;  %v1126_v5 = vmul.f32 %v1124_v2, %v1092_v3  ;;  %v1094_v6 = vsel %vm1093_vm1, %v1070_v47, %v1092_v3  ;;  %v1102_v8 = vmul.f32 %v1100_v7, %v1092_v3 }
 0x15b   : > { %1096 = vst.msk [vmem:[%s315_s23] sm:$0x3] %vm1095_vm4, %v1094_v6 }
 0x15c   : > { %1128 = vrot.lane.b32.xlu0 %v1126_v5, %s1714_s29  ;;  %1116 = vrot.lane.b32.xlu1 %v1114_v4, %s1714_s29 }
 0x160   : > { %1104 = vrot.lane.b32.xlu1 %v1102_v8, %s1714_s29 }
 0x1ce   : > { %v1129_v10 = vpop.permute.xlu0 %1128  ;;  %v1117_v11 = vpop.permute.xlu1 %1116 }
 0x1cf   : > { %v1119_v12 = vadd.f32 %v1117_v11, %v1070_v47  ;;  %v1131_v13 = vadd.f32 %v1129_v10, %v1070_v47 }
 0x1d1   : > { %v1133_v15 = vrot.slane %v1119_v12, 6  ;;  %v1136_v17 = vrot.slane %v1131_v13, 4 }
 0x1d2   : > { %v1105_v14 = vpop.permute.xlu1 %1104 }
 0x1d3   : > { %v1107_v16 = vadd.f32 %v1105_v14, %v1070_v47 }
 0x1d5   : > { %v1139_v18 = vsel %vm1138_vm5, %v1107_v16, %v1133_v15 }
 0x1d6   : > { %v1141_v19 = vsel %vm1140_vm6, %v1139_v18, %v1136_v17 }
 0x1d7   : > { %v1142_v20 = vpack.c.bf16 %v1141_v19, %v1141_v19 }
 0x1d9   : > { %1528 = vmatmul.mubr.msk.bf16.vlgmr.msra.gmra.mrb[8].mxu0 %vm1093_vm1, %v1142_v20 }
 0x1da   : > { %1659 = shalt.err (!%p1656_p3)
}
 0x1db   : > { %s1660_s28 = scalar_lea.hbm %s1928_s15, 32  ;;  %s1664_s29 = scalar_lea.hbm %s1981_s7, 64 }
 0x1dc   : > { %p1661_p4 = scmp.ne.s32.totalorder %s1928_s15, %s1660_s28  ;;  %p1665_p9 = scmp.lt.u32.totalorder %s1928_s15, %s1981_s7 }
 0x1dd   : > { %p1666_p10 = scmp.lt.u32.totalorder %s1664_s29, %s1660_s28  ;;  %p1668_p12 = scmp.lt.u32.totalorder %s1660_s28, %s1928_s15 }
 0x1de   : > { %p1662_p7 = pnand %p1661_p4, %p1794_p5 }
 0x1df   : > { %p1667_p11 = por %p1666_p10, %p1665_p9 }
 0x1e0   : > { %p1663_p8 = pneg %p1662_p7 }
 0x1e1   : > { %p1669_p13 = por %p1668_p12, %p1667_p11 }
 0x1e3   : > { %p1670_p0 = pnand %p1669_p13, %p1663_p8 }
 0x1e5   : > { %1673 = shalt.err (!%p1670_p0)
}
 0x1e6   : > { %1531 = dma.vmem_to_hbm [thread:$0]  (%p1794_p5), %s1233_s9, 32, %s1928_s15, %s1216_s16   ;;  %vm1209_vm7 = vcmask 128000  }
 0x1e7   : > { %s331_s19 = scalar_lea.vmem %s1978_s4, %s1812_s17  ;;  %s1354_s20 = sshll.u32 %s1812_s17, 3 }
 0x1e8   : > { %v1422_v21 = vld [vmem:[%s331_s19] ss:$0 sm:$0xff]  ;;  %s335_s23 = scalar_lea.vmem %s1980_s6, %s1354_s20 }
 0x2ac   : > { %v1203_v22 = vpop.f32.mrb[8].mxu0 }
 0x2ad   : > { %v1204_v23 = vadd.f32 %v1422_v21, %v1203_v22  ;;  %v1529_v24 = vpop.f32.mrb[9].mxu0 }
 0x2ae   : > { %v1206_v25 = vpop.f32.mrb[10].mxu0 }
 0x2af   : > { %1210 = vst.msk [vmem:[%s335_s23] sm:$0x3f] %vm1209_vm7, %v1204_v23  ;;  %v1530_v26 = vpop.f32.mrb[11].mxu0 }
 0x2b0 PF: > { %p1537_p5 = scmp.ge.s32.totalorder %s1708_s27, 2  ;;  %s1251_s11 = sand.u32 1, %s1696_s24  }
 0x2b1   : > { %s1252_s17 = scalar_lea.sflag [#allocation3], %s1251_s11 }
 0x2b2   : > { %p1534_p1 = pnand %p1537_p5, %p1798_p6 }
 0x2b4   : > { %1691 = dma.done.wait (!%p1534_p1), %s1252_s17, 32  }
 0x2b5   : > { %1693 = vsyncadd (!%p1534_p1), %s1252_s17, 4294967264  ;;  %p18_p2 = scmp.ge.s32.totalorder %s1781_s30, 4   ;;  %s1984_s24 = smov %s1700_s25 }
 0x2b6   : > { %s1985_s25 = smov %s1704_s26  ;;  %s1986_s26 = smov %s1792_s10 }
 0x2b7   : > { %s1987_s27 = smov %s1781_s30  ;;  %20 = sbr.rel (!%p18_p2) target bundleno = 3 (0x3), region = 102 }
 0x2be   :  { %1257 = vsyncpa [#allocation3], 1 }
 0x2bf   :  { %1259 = vsyncpa [#allocation3 + $0x1], 1 }

</bundles_post_ra>
